<compile_context>
chip_gen: v5e
topology: v5e:2x2
jax: 0.10.0
libtpu: 0.0.40
codegen_flags: <defaults>
</compile_context>

<pallas_src>
import functools

import jax
import jax.numpy as jnp
from jax.experimental import pallas as pl
from jax.experimental.pallas import tpu as pltpu

# ----- config (mirrors conf.* in the PyTorch module, at small synthetic sizes) -----
HIDDEN_DIM = 128        # conf.hidden_dim (stands in for 768; value_mapping is D->D)
NUM_VIEWS = 8           # conf.num_predefined_view
VIEWS_PER_DOC = 2       # conf.num_view_per_doc
SEQ_LEN = 16
VOCAB = 64
N_Q = 2                 # number of questions
N_D = 4                 # number of context docs

# Docs per grid step. Keep n_d // DOCS_PER_TILE >= 2 (and even) so v7x's two
# TensorCores both get work; size per target-chip VMEM at realistic shapes
# (~2.3 MiB/doc at D=768, seq=512 -> <= ~8-12 docs/tile on v7x, ~2x that on v5e/v6e).
DOCS_PER_TILE = 2


# --------------------------- question encoder kernel ---------------------------

def _q_encoder_kernel(xq_ref, wq_ref, bq_ref, out_ref):
    # Only the representation-token rows are encoded (the full question sequence
    # output is discarded by the reference forward).
    acc = jnp.dot(xq_ref[...], wq_ref[...], preferred_element_type=jnp.float32)
    out_ref[...] = jnp.tanh(acc + bq_ref[...])


# --------------------------- fused ctx-path kernel ---------------------------

def _ctx_fused_kernel(xc_ref, wc_ref, bc_ref, ve_ref, wv_ref, bv_ref,
                      cpool_ref, docview_ref, attn_ref,
                      *, dpt, seq, seq_pad, n_views, k, rep_pos):
    f32 = jnp.float32
    bf16 = jnp.bfloat16
    D = wc_ref.shape[0]

    # ---- ctx encoder for this doc tile: one (dpt*seq_pad, D) @ (D, D) MXU pass ----
    c_acc = jnp.dot(xc_ref[...], wc_ref[...], preferred_element_type=f32)
    ctx_f32 = jnp.tanh(c_acc + bc_ref[...])                       # (dpt*seq_pad, D) f32
    ctx3_f32 = ctx_f32.reshape(dpt, seq_pad, D)

    # pooled rows: static (compile-time) slice — no selector matmul.
    ctx_pooled = ctx3_f32[:, rep_pos, :]                          # (dpt, D) f32
    cpool_ref[0] = ctx_pooled

    # Single bf16 copy of the encoded sequence feeds BOTH attention matmuls.
    ctx_bf = ctx_f32.astype(bf16).reshape(dpt, seq_pad, D)

    # ---- retrieve_view: top-2 views per doc (softmax is monotone -> raw logits) ----
    logits = jax.lax.dot_general(ctx_pooled.astype(bf16), ve_ref[...],
                                 (((1,), (1,)), ((), ())),
                                 preferred_element_type=f32)      # (dpt, n_views)
    col = jax.lax.broadcasted_iota(jnp.int32, (dpt, n_views), 1)
    # TODO(synk): top-k selection hardcoded for k == 2 (conf.num_view_per_doc);
    # tie-breaking = min index among maxima (matches torch only up to ties).
    m1 = jnp.max(logits, axis=-1, keepdims=True)
    i1 = jnp.min(jnp.where(logits >= m1, col, n_views), axis=-1, keepdims=True)
    l2 = jnp.where(col == i1, -jnp.inf, logits)
    m2 = jnp.max(l2, axis=-1, keepdims=True)
    i2 = jnp.min(jnp.where(l2 >= m2, col, n_views), axis=-1, keepdims=True)

    # (dpt*k, n_views) one-hot via broadcast over the slot axis — no replication matmul.
    slot = jax.lax.broadcasted_iota(jnp.int32, (dpt, k, n_views), 1)
    colk = jax.lax.broadcasted_iota(jnp.int32, (dpt, k, n_views), 2)
    target = jnp.where(slot == 0, i1[:, :, None], i2[:, :, None])
    onehot = (colk == target).astype(bf16).reshape(dpt * k, n_views)

    # gather top views as a one-hot matmul (stays on the MXU, no gather op)
    top_view = jnp.dot(onehot, ve_ref[...], preferred_element_type=f32)   # (dpt*k, D)
    q3 = top_view.reshape(dpt, k, D).astype(bf16)

    # ---- attention(query=top_view, value=ctx_seq), batched over the doc tile ----
    score = jnp.einsum('dkh,dnh->dkn', q3, ctx_bf,
                       preferred_element_type=f32)                # (dpt, k, seq_pad)
    if seq_pad != seq:
        # Mask the artificial pad keys with -inf so softmax over seq_pad columns is
        # exactly softmax over the real `seq` columns (matches the PyTorch module,
        # which softmaxes over the full sequence with no ctx_attn_mask inside attn).
        keyc = jax.lax.broadcasted_iota(jnp.int32, (dpt, k, seq_pad), 2)
        score = jnp.where(keyc < seq, score, -jnp.inf)
    m = jnp.max(score, axis=-1, keepdims=True)
    e = jnp.exp(score - m)
    attn = e / jnp.sum(e, axis=-1, keepdims=True)                 # exact f32 softmax
    attn_ref[0] = attn.reshape(dpt * k, seq_pad)

    # value path reordered: (attn @ value) @ Wv + bv == attn @ (value @ Wv + bv),
    # exact because each softmax row sums to 1 (exact f32 divide above); shrinks the
    # DxD matmul LHS from `seq` rows to `k` rows per doc.
    # TODO(synk): training-mode dropout(0.5) on the mapped values omitted (eval identity).
    ctx_att = jnp.einsum('dkn,dnh->dkh', attn.astype(bf16), ctx_bf,
                         preferred_element_type=f32)              # (dpt, k, D)
    dv = jnp.dot(ctx_att.reshape(dpt * k, D).astype(bf16), wv_ref[...],
                 preferred_element_type=f32) + bv_ref[...]        # (dpt*k, D)
    docview_ref[0] = dv


# --------------------------- Pallas wrappers ---------------------------

def biencoder_q_pooled_call(xq_rep, w_q, b_q):
    n_q, D = xq_rep.shape
    return pl.pallas_call(
        _q_encoder_kernel,
        out_shape=jax.ShapeDtypeStruct((n_q, D), jnp.float32),
    )(xq_rep.astype(jnp.bfloat16), w_q.astype(jnp.bfloat16), b_q.astype(jnp.float32))


def biencoder_ctx_fused_call(xc_flat, w_ctx, b_ctx, view_embed, w_value, b_value,
                             *, n_d, seq, seq_pad, k, rep_pos, docs_per_tile):
    _, D = xc_flat.shape
    n_views = view_embed.shape[0]
    dpt = docs_per_tile
    assert n_d % dpt == 0, "n_d must be a multiple of docs_per_tile"
    n_tiles = n_d // dpt
    bf16 = jnp.bfloat16

    kern = functools.partial(_ctx_fused_kernel, dpt=dpt, seq=seq, seq_pad=seq_pad,
                             n_views=n_views, k=k, rep_pos=rep_pos)

    ctx_pooled_t, doc_view_t, attn_t = pl.pallas_call(
        kern,
        out_shape=(
            jax.ShapeDtypeStruct((n_tiles, dpt, D), jnp.float32),           # ctx_pooled
            jax.ShapeDtypeStruct((n_tiles, dpt * k, D), jnp.float32),       # doc_view
            jax.ShapeDtypeStruct((n_tiles, dpt * k, seq_pad), jnp.float32), # attn (padded)
        ),
        grid=(n_tiles,),
        in_specs=[
            # per-tile ctx tokens: double-buffered HBM->VMEM DMA behind the matmul
            pl.BlockSpec((dpt * seq_pad, D), lambda i: (i, 0)),
            # weights / biases / view table: constant index map -> VMEM-resident
            pl.BlockSpec((D, D), lambda i: (0, 0)),
            pl.BlockSpec((1, D), lambda i: (0, 0)),
            pl.BlockSpec((n_views, D), lambda i: (0, 0)),
            pl.BlockSpec((D, D), lambda i: (0, 0)),
            pl.BlockSpec((1, D), lambda i: (0, 0)),
        ],
        out_specs=(
            pl.BlockSpec((1, dpt, D), lambda i: (i, 0, 0)),
            pl.BlockSpec((1, dpt * k, D), lambda i: (i, 0, 0)),
            pl.BlockSpec((1, dpt * k, seq_pad), lambda i: (i, 0, 0)),
        ),
        compiler_params=pltpu.CompilerParams(
            dimension_semantics=("parallel",),          # dual-TC sharding on v7x
            vmem_limit_bytes=32 * 1024 * 1024,
        ),
    )(
        xc_flat.astype(bf16),
        w_ctx.astype(bf16), b_ctx.astype(jnp.float32),
        view_embed.astype(bf16),
        w_value.astype(bf16), b_value.astype(jnp.float32),
    )

    ctx_pooled = ctx_pooled_t.reshape(n_d, D)
    doc_view = doc_view_t.reshape(n_tiles, dpt, k, D).reshape(n_d, k, D)
    attn = attn_t.reshape(n_tiles, dpt, k, seq_pad).reshape(n_d, k, seq_pad)[..., :seq]
    return ctx_pooled, doc_view, attn


# --------------------------- model (glue) ---------------------------

def init_params(key):
    ks = jax.random.split(key, 6)
    return dict(
        tok_emb=jax.random.normal(ks[0], (VOCAB, HIDDEN_DIM), jnp.float32) * 0.02,
        seg_emb=jax.random.normal(ks[1], (2, HIDDEN_DIM), jnp.float32) * 0.02,
        w_q=jax.random.normal(ks[2], (HIDDEN_DIM, HIDDEN_DIM), jnp.float32) * 0.05,
        b_q=jnp.zeros((1, HIDDEN_DIM), jnp.float32),
        w_ctx=jax.random.normal(ks[3], (HIDDEN_DIM, HIDDEN_DIM), jnp.float32) * 0.05,
        b_ctx=jnp.zeros((1, HIDDEN_DIM), jnp.float32),
        view_embed=jax.random.normal(ks[4], (NUM_VIEWS, HIDDEN_DIM), jnp.float32),
        w_value=jax.random.normal(ks[5], (HIDDEN_DIM, HIDDEN_DIM), jnp.float32) * 0.05,
        b_value=jnp.zeros((1, HIDDEN_DIM), jnp.float32),
    )


def _embed(ids, segments, attn_mask, tok_emb, seg_emb):
    # Synthetic stand-in for the external BERT sub_model's embedding stage (XLA gather).
    x = tok_emb[ids] + seg_emb[segments]                              # (B, N, D)
    return x * attn_mask[..., None].astype(jnp.float32)


def biencoder_forward(params, question_ids, question_segments, question_attn_mask,
                      context_ids, ctx_segments, ctx_attn_mask,
                      representation_token_pos=0):
    xq = _embed(question_ids, question_segments, question_attn_mask,
                params["tok_emb"], params["seg_emb"])                 # (n_q, N, D)
    xc = _embed(context_ids, ctx_segments, ctx_attn_mask,
                params["tok_emb"], params["seg_emb"])                 # (n_d, N, D)
    xq_rep = xq[:, representation_token_pos, :]                       # (n_q, D)
    n_d, seq, D = xc.shape

    # Pad the sequence axis to a lane multiple so the in-kernel attention tensors and
    # the attn output are lane-dense (pad keys masked with -inf inside the kernel).
    seq_pad = ((seq + 127) // 128) * 128
    if seq_pad != seq:
        xc = jnp.pad(xc, ((0, 0), (0, seq_pad - seq), (0, 0)))
    xc_flat = xc.reshape(n_d * seq_pad, D)                            # (n_d*seq_pad, D)

    q_pooled = biencoder_q_pooled_call(xq_rep, params["w_q"], params["b_q"])
    ctx_pooled, doc_view, attn = biencoder_ctx_fused_call(
        xc_flat, params["w_ctx"], params["b_ctx"],
        params["view_embed"], params["w_value"], params["b_value"],
        n_d=n_d, seq=seq, seq_pad=seq_pad, k=VIEWS_PER_DOC,
        rep_pos=representation_token_pos, docs_per_tile=DOCS_PER_TILE)
    return q_pooled, ctx_pooled, doc_view, attn


if __name__ == "__main__":
    key = jax.random.PRNGKey(0)
    pkey, k1, k2 = jax.random.split(key, 3)
    params = init_params(pkey)

    question_ids = jax.random.randint(k1, (N_Q, SEQ_LEN), 0, VOCAB, dtype=jnp.int32)
    context_ids = jax.random.randint(k2, (N_D, SEQ_LEN), 0, VOCAB, dtype=jnp.int32)
    question_segments = jnp.zeros((N_Q, SEQ_LEN), jnp.int32)
    ctx_segments = jnp.zeros((N_D, SEQ_LEN), jnp.int32)
    question_attn_mask = jnp.ones((N_Q, SEQ_LEN), jnp.int32)
    ctx_attn_mask = jnp.ones((N_D, SEQ_LEN), jnp.int32)

    q_pooled, ctx_pooled, doc_view, attn = biencoder_forward(
        params, question_ids, question_segments, question_attn_mask,
        context_ids, ctx_segments, ctx_attn_mask)
    jax.block_until_ready((q_pooled, ctx_pooled, doc_view, attn))

    assert q_pooled.shape == (N_Q, HIDDEN_DIM)
    assert ctx_pooled.shape == (N_D, HIDDEN_DIM)
    assert doc_view.shape == (N_D, VIEWS_PER_DOC, HIDDEN_DIM)
    assert attn.shape == (N_D, VIEWS_PER_DOC, SEQ_LEN)
    assert bool(jnp.all(jnp.isfinite(doc_view))) and bool(jnp.all(jnp.isfinite(attn)))
    # softmax rows over the real sequence positions must sum to ~1
    assert bool(jnp.all(jnp.abs(jnp.sum(attn, axis=-1) - 1.0) < 1e-4))
    print("KERNEL_OK")
</pallas_src>

<mosaic_0001>
module attributes {stable_mosaic.version = 11 : i64} {
  func.func @_q_encoder_kernel(%arg0: memref<2x128xbf16, #tpu.memory_space<vmem>>, %arg1: memref<128x128xbf16, #tpu.memory_space<vmem>>, %arg2: memref<1x128xf32, #tpu.memory_space<vmem>>, %arg3: memref<2x128xf32, #tpu.memory_space<vmem>>) attributes {dimension_semantics = [], scalar_prefetch = 0 : i64, scratch_operands = 0 : i64, tpu.core_type = #tpu.core_type<tc>} {
    %c0 = arith.constant 0 : index
    %c0_0 = arith.constant 0 : index
    %0 = vector.load %arg0[%c0, %c0_0] : memref<2x128xbf16, #tpu.memory_space<vmem>>, vector<2x128xbf16>
    %c0_1 = arith.constant 0 : index
    %c0_2 = arith.constant 0 : index
    %1 = vector.load %arg1[%c0_1, %c0_2] : memref<128x128xbf16, #tpu.memory_space<vmem>>, vector<128x128xbf16>
    %cst = arith.constant dense<0.000000e+00> : vector<2x128xf32>
    %2 = tpu.matmul %0, %1, %cst {dimension_numbers = #tpu.dot_dimension_numbers<[1], [0], [0], [1], [0, 0, 1, 1], [], []>} : vector<2x128xbf16>, vector<128x128xbf16>, vector<2x128xf32> -> vector<2x128xf32>
    %c0_3 = arith.constant 0 : index
    %c0_4 = arith.constant 0 : index
    %3 = vector.load %arg2[%c0_3, %c0_4] : memref<1x128xf32, #tpu.memory_space<vmem>>, vector<1x128xf32>
    %4 = vector.broadcast %3 : vector<1x128xf32> to vector<2x128xf32>
    %5 = arith.addf %2, %4 : vector<2x128xf32>
    %6 = math.tanh %5 : vector<2x128xf32>
    %c0_5 = arith.constant 0 : index
    %c0_6 = arith.constant 0 : index
    %7 = vector.load %arg3[%c0_5, %c0_6] : memref<2x128xf32, #tpu.memory_space<vmem>>, vector<2x128xf32>
    tpu.vector_store %arg3[%c0_5, %c0_6], %6 {strides = array<i32>} : memref<2x128xf32, #tpu.memory_space<vmem>>, vector<2x128xf32>,
    return
  }
}

</mosaic_0001>

<bundles_post_ra>
// kernel: tpu_custom_call.1
= control target key start
LH: loop header
LB: loop body
LE: loop exit
PB: predicated region body
PF: predicated region fallthrough
CT: control target
= control target key end

     0   :  { %8 = vsyncpa [#allocation3], 0  ;;  %s310_s0 = inlined_call_operand.hbm [shape: bf16[2,128], index: 0, kind: input, shape index: {}]   ;;  %s311_s1 = inlined_call_operand.hbm [shape: bf16[128,128], index: 1, kind: input, shape index: {}]   ;;  %s312_s2 = inlined_call_operand.vmem [shape: f32[1,128], index: 2, kind: input, shape index: {}]   ;;  %s313_s3 = inlined_call_operand.hbm [shape: f32[2,128], index: 3, kind: output, shape index: {}]  }
   0x1   :  { %9 = vsyncpa [#allocation6], 0 }
   0x2   :  { %10 = vsyncpa [#allocation4], 0  ;;  %s16_s14 = sshll.u32 %s310_s0, 4  ;;  %s273_s15 = smov [#allocation2]   ;;  %s17_s14 = int_to_ptr.hbm [resolvable:$true] %s16_s14 }
   0x3   :  { %s18_s16 = sshll.u32 %s273_s15, 4  ;;  %s26_s19 = sshll.u32 %s311_s1, 4  ;;  %s19_s16 = int_to_ptr.vmem [resolvable:$true] %s18_s16  ;;  %s27_s19 = int_to_ptr.hbm [resolvable:$true] %s26_s19 }
   0x4   :  { %21 = dma.hbm_to_vmem [thread:$0]  %s17_s14, 16, %s19_s16, [#allocation3]  }
   0x5   :  { %s274_s20 = smov [#allocation5]   ;;  %s275_s22 = smov 64  }
   0x6   :  { %s28_s21 = sshll.u32 %s274_s20, 4  ;;  %s276_s23 = smov 4   ;;  %s29_s21 = int_to_ptr.vmem [resolvable:$true] %s28_s21 }
   0x7   :  { %34 = dma.hbm_to_vmem [thread:$0]  %s27_s19, 1024, %s29_s21, [#allocation6], %s275_s22, %s275_s22, %s276_s23  }
   0x8   :  { %267 = dma.done.wait [#allocation3], 16  }
   0x9   :  { %268 = vsyncadd [#allocation3], 4294967280 }
   0xa   :  { %269 = dma.done.wait [#allocation6], 1024  }
   0xb   :  { %270 = vsyncadd [#allocation6], 4294966272  ;;  %v186_v0 = vld [vmem:[#allocation5 + $0x38] sm:$0xff]  ;;  %v185_v1 = vld [vmem:[#allocation5 + $0x30] sm:$0xff]  ;;  %s277_s24 = smov [#allocation7]   ;;  %s136_s28 = sshll.u32 %s313_s3, 4  ;;  %s137_s28 = int_to_ptr.hbm [resolvable:$true] %s136_s28 }
   0xc   :  { %114 = vmatpush.bf16.msra.mxu0 %v186_v0  ;;  %v184_v2 = vld [vmem:[#allocation5 + $0x28] sm:$0xff]  ;;  %v183_v3 = vld [vmem:[#allocation5 + $0x20] sm:$0xff]  ;;  %v182_v4 = vld [vmem:[#allocation5 + $0x18] sm:$0xff]  ;;  %s134_s25 = sshll.u32 %s277_s24, 4  ;;  %s135_s25 = int_to_ptr.vmem [resolvable:$true] %s134_s25 }
   0xd   :  { %v181_v5 = vld [vmem:[#allocation5 + $0x10] sm:$0xff]  ;;  %v180_v6 = vld [vmem:[#allocation5 + $0x8] sm:$0xff]  ;;  %v179_v7 = vld [vmem:[#allocation5] sm:$0xff] }
   0xe   :  { %v45_v8 = vld [vmem:[#allocation2] sm:$0x1] }
   0xf   :  { %v192_v9 = vld [vmem:[%s312_s2] ss:$0 sm:$0xff] }
  0x10   :  { %115 = vmatpush.bf16.msra.mxu0 %v185_v1 }
  0x14   :  { %116 = vmatpush.bf16.msra.mxu0 %v184_v2 }
  0x18   :  { %117 = vmatpush.bf16.msra.mxu0 %v183_v3 }
  0x1c   :  { %118 = vmatpush.bf16.msra.mxu0 %v182_v4 }
  0x20   :  { %119 = vmatpush.bf16.msra.mxu0 %v181_v5 }
  0x24   :  { %120 = vmatpush.bf16.msra.mxu0 %v180_v6 }
  0x28   :  { %121 = vmatpush.bf16.msra.mxu0 %v179_v7 }
  0x2b   :  { %122 = vmatmul.bf16.vlgmr.msra.gmra.mxu0 %v45_v8 }
  0xa8   :  { %v123_v10 = vpop.f32.mrf.mxu0 }
  0xa9   :  { %v124_v11 = vadd.f32 %v192_v9, %v123_v10 }
  0xab   :  { %193 = vtanh.f32 %v124_v11 }
  0xb0   :  { %v125_v12 = vpop.f32.mrf.mxu0 }
  0xb1   :  { %v194_v13 = vpop.eup %193 }
  0xb2   :  { %128 = vst [vmem:[#allocation7] sm:$0x3] %v194_v13 }
  0xb3   :  { %139 = dma.vmem_to_hbm [thread:$0]  %s135_s25, 32, %s137_s28, [#allocation4]  }
  0xb4   :  { %271 = dma.done.wait [#allocation4], 32  }
  0xb5   :  { %272 = vsyncadd [#allocation4], 4294967264 }
  0xb6   :  { %144 = vsyncpa [#allocation3], 1 }
  0xb7   :  { %145 = vsyncpa [#allocation6], 1 }
  0xb8   :  { %146 = vsyncpa [#allocation4], 1 }

</bundles_post_ra>
